<compile_context>
chip_gen: v7x
topology: tpu7x:2x2x1
jax: 0.10.0
libtpu: 0.0.40
codegen_flags: <defaults>
</compile_context>

<pallas_src>
import functools

import jax
import jax.numpy as jnp
from jax.experimental import pallas as pl
from jax.experimental.pallas import tpu as pltpu


def _round_up(x, m):
    return ((x + m - 1) // m) * m


def _cdiv(a, b):
    return -(-a // b)


# --------------------------- fused kernel ---------------------------

def _fused_actor_critic_kernel(x_ref, w1_ref, b1_ref, w2_ref, b2_ref,
                               w3_ref, b3_ref, out_ref, *, action_dim):
    x = x_ref[...]

    # layer 1: [actor | critic | zero-pad] concatenated along the output dim
    h = jnp.tanh(jnp.dot(x, w1_ref[...], preferred_element_type=jnp.float32)
                 + b1_ref[...])
    # layer 2: block-diagonal (actor / critic halves stay independent)
    h = jnp.tanh(jnp.dot(h, w2_ref[...], preferred_element_type=jnp.float32)
                 + b2_ref[...])
    # layer 3: block-diagonal -> z = [actor logits (A) | value (1) | zeros]
    z = jnp.dot(h, w3_ref[...], preferred_element_type=jnp.float32) + b3_ref[...]

    col = jax.lax.broadcasted_iota(jnp.int32, z.shape, dimension=1)
    is_actor = col < action_dim

    # masked, numerically-stable softmax + log-softmax over the actor lanes
    zm = jnp.where(is_actor, z, -jnp.inf)
    m = jnp.max(zm, axis=-1, keepdims=True)
    e = jnp.exp(zm - m)                                   # exp(-inf) == 0
    s = jnp.sum(e, axis=-1, keepdims=True)
    inv = pl.reciprocal(s, approx=True)                   # EUP vrcp
    inv = inv * (2.0 - s * inv)                           # one Newton step
    probs = e * inv                                       # masked lanes -> 0
    logp = jnp.where(is_actor, zm - m - jnp.log(s), 0.0)  # safe log-probs
    entropy = -jnp.sum(probs * logp, axis=-1, keepdims=True)   # (TB, 1)

    out_ref[0, ...] = probs                               # lanes [0:A]
    out_ref[1, ...] = logp                                # lanes [0:A]
    is_value = col == action_dim
    is_ent = col == action_dim + 1
    out_ref[2, ...] = jnp.where(is_value, z, jnp.where(is_ent, entropy, 0.0))


# --------------------------- wrapper ---------------------------

def _pick_batch_tile(B):
    """Sublane(8)-aligned batch tile: minimal padding, <=2048 rows/tile, and
    >=2 grid steps whenever possible (so v7x's two TensorCores both work)."""
    n = max(1, _cdiv(B, 2048))
    if n == 1 and B > 8:
        n = 2
    TB = _round_up(_cdiv(B, n), 8)
    B_pad = TB * _cdiv(B, TB)
    return TB, B_pad


def actor_critic_forward(state, packed):
    """Fused forward.

    Returns (action_probs (B, A), action_logprobs (B, A),
             state_values (B, 1), dist_entropy (B,))."""
    B, state_dim = state.shape
    W1, b1 = packed["W1"], packed["b1"]
    W2, b2 = packed["W2"], packed["b2"]
    W3, b3 = packed["W3"], packed["b3"]
    action_dim = packed["action_dim"]
    H2p = W1.shape[1]          # padded fused hidden width (multiple of 128)
    OUT_Z = W3.shape[1]        # padded output width (multiple of 128)

    TB, B_pad = _pick_batch_tile(B)
    if B_pad != B:
        state = jnp.pad(state, ((0, B_pad - B), (0, 0)))

    kernel = functools.partial(_fused_actor_critic_kernel, action_dim=action_dim)

    out = pl.pallas_call(
        kernel,
        out_shape=jax.ShapeDtypeStruct((3, B_pad, OUT_Z), jnp.float32),
        grid=(B_pad // TB,),
        in_specs=[
            pl.BlockSpec((TB, state_dim), lambda i: (i, 0)),   # x: tiled over batch
            pl.BlockSpec((state_dim, H2p), lambda i: (0, 0)),  # weights / biases:
            pl.BlockSpec((1, H2p), lambda i: (0, 0)),          # pinned VMEM-resident
            pl.BlockSpec((H2p, H2p), lambda i: (0, 0)),
            pl.BlockSpec((1, H2p), lambda i: (0, 0)),
            pl.BlockSpec((H2p, OUT_Z), lambda i: (0, 0)),
            pl.BlockSpec((1, OUT_Z), lambda i: (0, 0)),
        ],
        out_specs=pl.BlockSpec((3, TB, OUT_Z), lambda i: (0, i, 0)),
        compiler_params=pltpu.CompilerParams(
            dimension_semantics=("parallel",)),                # shard batch on v7x
    )(state, W1, b1, W2, b2, W3, b3)

    probs = out[0, :B, :action_dim]
    logp = out[1, :B, :action_dim]
    values = out[2, :B, action_dim:action_dim + 1]
    entropy = out[2, :B, action_dim + 1]
    return probs, logp, values, entropy


# ---------------- glue: Categorical ops (act / evaluate) ----------------

def act(state, packed, key):
    _, logp, values, _ = actor_critic_forward(state, packed)
    action = jax.random.categorical(key, logp, axis=-1)
    action_logprob = jnp.take_along_axis(logp, action[:, None], axis=-1)[:, 0]
    return action, action_logprob, values


def evaluate(state, action, packed):
    _, logp, values, entropy = actor_critic_forward(state, packed)
    action_logprobs = jnp.take_along_axis(logp, action[:, None], axis=-1)[:, 0]
    return action_logprobs, values, entropy


# ---------------- parameter init & one-time packing ----------------

def init_params(key, state_dim, action_dim, hidden_size):
    def linear(k, fan_in, fan_out):
        # PyTorch nn.Linear default init: U(-1/sqrt(fan_in), 1/sqrt(fan_in)).
        kw, kb = jax.random.split(k)
        bound = 1.0 / jnp.sqrt(fan_in)
        w = jax.random.uniform(kw, (fan_in, fan_out), jnp.float32, -bound, bound)
        b = jax.random.uniform(kb, (1, fan_out), jnp.float32, -bound, bound)
        return w, b

    ks = jax.random.split(key, 6)
    aw1, ab1 = linear(ks[0], state_dim, hidden_size)
    aw2, ab2 = linear(ks[1], hidden_size, hidden_size)
    aw3, ab3 = linear(ks[2], hidden_size, action_dim)
    cw1, cb1 = linear(ks[3], state_dim, hidden_size)
    cw2, cb2 = linear(ks[4], hidden_size, hidden_size)
    cw3, cb3 = linear(ks[5], hidden_size, 1)
    return dict(aw1=aw1, ab1=ab1, aw2=aw2, ab2=ab2, aw3=aw3, ab3=ab3,
                cw1=cw1, cb1=cb1, cw2=cw2, cb2=cb2, cw3=cw3, cb3=cb3)


def pack_params(p):
    """One-time (outside the hot loop) packing into fused, 128-lane-padded,
    block-diagonal form."""
    S, H = p["aw1"].shape
    A = p["aw3"].shape[1]
    H2 = 2 * H
    H2p = _round_up(H2, 128)              # padded fused hidden width
    OUT_Z = _round_up(A + 2, 128)         # lanes: [0:A] logits, A value, A+1 entropy

    f32 = jnp.float32
    W1 = jnp.zeros((S, H2p), f32).at[:, :H].set(p["aw1"]).at[:, H:H2].set(p["cw1"])
    b1 = jnp.zeros((1, H2p), f32).at[:, :H].set(p["ab1"]).at[:, H:H2].set(p["cb1"])
    W2 = (jnp.zeros((H2p, H2p), f32)
          .at[:H, :H].set(p["aw2"])
          .at[H:H2, H:H2].set(p["cw2"]))
    b2 = jnp.zeros((1, H2p), f32).at[:, :H].set(p["ab2"]).at[:, H:H2].set(p["cb2"])
    W3 = (jnp.zeros((H2p, OUT_Z), f32)
          .at[:H, :A].set(p["aw3"])
          .at[H:H2, A:A + 1].set(p["cw3"]))
    b3 = jnp.zeros((1, OUT_Z), f32).at[:, :A].set(p["ab3"]).at[:, A:A + 1].set(p["cb3"])
    return dict(W1=W1, b1=b1, W2=W2, b2=b2, W3=W3, b3=b3, action_dim=int(A))


# ---------------------------- demo / check ----------------------------

if __name__ == "__main__":
    B, STATE_DIM, ACTION_DIM, HIDDEN = 8, 16, 4, 32

    root = jax.random.PRNGKey(0)
    k_params, k_state, k_sample = jax.random.split(root, 3)

    raw = init_params(k_params, STATE_DIM, ACTION_DIM, HIDDEN)
    packed = pack_params(raw)
    state = jax.random.normal(k_state, (B, STATE_DIM), jnp.float32)

    # fused forward: probs, log-probs, values and entropy all from one kernel
    probs, logp, values, entropy = actor_critic_forward(state, packed)
    probs, logp, values, entropy = jax.block_until_ready(
        (probs, logp, values, entropy))

    # exercise act() and evaluate() glue paths too
    action, logp_act, v_act = act(state, packed, k_sample)
    logp_ev, v_ev, ent_ev = evaluate(state, action, packed)
    jax.block_until_ready((action, logp_act, v_act, logp_ev, v_ev, ent_ev))

    # sanity: reference in plain JAX against the unpacked (PyTorch-style) params
    def ref_forward(x, p):
        h = jnp.tanh(x @ p["aw1"] + p["ab1"])
        h = jnp.tanh(h @ p["aw2"] + p["ab2"])
        probs_ref = jax.nn.softmax(h @ p["aw3"] + p["ab3"], axis=-1)
        g = jnp.tanh(x @ p["cw1"] + p["cb1"])
        g = jnp.tanh(g @ p["cw2"] + p["cb2"])
        return probs_ref, g @ p["cw3"] + p["cb3"]

    p_ref, v_ref = ref_forward(state, raw)
    logp_ref = jnp.log(p_ref)
    ent_ref = -jnp.sum(p_ref * logp_ref, axis=-1)

    assert probs.shape == (B, ACTION_DIM) and values.shape == (B, 1)
    assert logp.shape == (B, ACTION_DIM) and entropy.shape == (B,)
    assert jnp.allclose(probs, p_ref, atol=1e-5), "actor probs mismatch"
    assert jnp.allclose(logp, logp_ref, atol=1e-5), "log-probs mismatch"
    assert jnp.allclose(values, v_ref, atol=1e-5), "critic values mismatch"
    assert jnp.allclose(entropy, ent_ref, atol=1e-5), "entropy mismatch"
    assert jnp.allclose(jnp.sum(probs, axis=-1), 1.0, atol=1e-5)

    print("KERNEL_OK")
</pallas_src>

<mosaic_0001>
module attributes {stable_mosaic.version = 11 : i64} {
  func.func @_fused_actor_critic_kernel(%arg0: i32, %arg1: memref<8x16xf32, #tpu.memory_space<vmem>>, %arg2: memref<16x128xf32, #tpu.memory_space<vmem>>, %arg3: memref<1x128xf32, #tpu.memory_space<vmem>>, %arg4: memref<128x128xf32, #tpu.memory_space<vmem>>, %arg5: memref<1x128xf32, #tpu.memory_space<vmem>>, %arg6: memref<128x128xf32, #tpu.memory_space<vmem>>, %arg7: memref<1x128xf32, #tpu.memory_space<vmem>>, %arg8: memref<3x8x128xf32, #tpu.memory_space<vmem>>) attributes {dimension_semantics = [#tpu.dimension_semantics<parallel>], iteration_bounds = array<i64: 1>, scalar_prefetch = 0 : i64, scratch_operands = 0 : i64, tpu.core_type = #tpu.core_type<tc>, window_params = [{transform_indices = @transform_0, window_bounds = array<i64: 8, 16>}, {pipeline_mode = #tpu.pipeline_mode<synchronous>, transform_indices = @transform_1, window_bounds = array<i64: 16, 128>}, {pipeline_mode = #tpu.pipeline_mode<synchronous>, transform_indices = @transform_2, window_bounds = array<i64: 1, 128>}, {pipeline_mode = #tpu.pipeline_mode<synchronous>, transform_indices = @transform_3, window_bounds = array<i64: 128, 128>}, {pipeline_mode = #tpu.pipeline_mode<synchronous>, transform_indices = @transform_4, window_bounds = array<i64: 1, 128>}, {pipeline_mode = #tpu.pipeline_mode<synchronous>, transform_indices = @transform_5, window_bounds = array<i64: 128, 128>}, {pipeline_mode = #tpu.pipeline_mode<synchronous>, transform_indices = @transform_6, window_bounds = array<i64: 1, 128>}, {transform_indices = @transform_7, window_bounds = array<i64: 3, 8, 128>}]} {
    %c0 = arith.constant 0 : index
    %c0_0 = arith.constant 0 : index
    %0 = vector.load %arg1[%c0, %c0_0] : memref<8x16xf32, #tpu.memory_space<vmem>>, vector<8x16xf32>
    %c0_1 = arith.constant 0 : index
    %c0_2 = arith.constant 0 : index
    %1 = vector.load %arg2[%c0_1, %c0_2] : memref<16x128xf32, #tpu.memory_space<vmem>>, vector<16x128xf32>
    %cst = arith.constant dense<0.000000e+00> : vector<8x128xf32>
    %2 = tpu.matmul %0, %1, %cst {dimension_numbers = #tpu.dot_dimension_numbers<[1], [0], [0], [1], [0, 0, 1, 1], [], []>} : vector<8x16xf32>, vector<16x128xf32>, vector<8x128xf32> -> vector<8x128xf32>
    %c0_3 = arith.constant 0 : index
    %c0_4 = arith.constant 0 : index
    %3 = vector.load %arg3[%c0_3, %c0_4] : memref<1x128xf32, #tpu.memory_space<vmem>>, vector<1x128xf32>
    %4 = vector.broadcast %3 : vector<1x128xf32> to vector<8x128xf32>
    %5 = arith.addf %2, %4 : vector<8x128xf32>
    %6 = math.tanh %5 : vector<8x128xf32>
    %c0_5 = arith.constant 0 : index
    %c0_6 = arith.constant 0 : index
    %7 = vector.load %arg4[%c0_5, %c0_6] : memref<128x128xf32, #tpu.memory_space<vmem>>, vector<128x128xf32>
    %cst_7 = arith.constant dense<0.000000e+00> : vector<8x128xf32>
    %8 = tpu.matmul %6, %7, %cst_7 {dimension_numbers = #tpu.dot_dimension_numbers<[1], [0], [0], [1], [0, 0, 1, 1], [], []>} : vector<8x128xf32>, vector<128x128xf32>, vector<8x128xf32> -> vector<8x128xf32>
    %c0_8 = arith.constant 0 : index
    %c0_9 = arith.constant 0 : index
    %9 = vector.load %arg5[%c0_8, %c0_9] : memref<1x128xf32, #tpu.memory_space<vmem>>, vector<1x128xf32>
    %10 = vector.broadcast %9 : vector<1x128xf32> to vector<8x128xf32>
    %11 = arith.addf %8, %10 : vector<8x128xf32>
    %12 = math.tanh %11 : vector<8x128xf32>
    %c0_10 = arith.constant 0 : index
    %c0_11 = arith.constant 0 : index
    %13 = vector.load %arg6[%c0_10, %c0_11] : memref<128x128xf32, #tpu.memory_space<vmem>>, vector<128x128xf32>
    %cst_12 = arith.constant dense<0.000000e+00> : vector<8x128xf32>
    %14 = tpu.matmul %12, %13, %cst_12 {dimension_numbers = #tpu.dot_dimension_numbers<[1], [0], [0], [1], [0, 0, 1, 1], [], []>} : vector<8x128xf32>, vector<128x128xf32>, vector<8x128xf32> -> vector<8x128xf32>
    %c0_13 = arith.constant 0 : index
    %c0_14 = arith.constant 0 : index
    %15 = vector.load %arg7[%c0_13, %c0_14] : memref<1x128xf32, #tpu.memory_space<vmem>>, vector<1x128xf32>
    %16 = vector.broadcast %15 : vector<1x128xf32> to vector<8x128xf32>
    %17 = arith.addf %14, %16 : vector<8x128xf32>
    %18 = tpu.iota {dimensions = array<i32: 1>} : vector<8x128xi32>
    %c4_i32 = arith.constant 4 : i32
    %19 = vector.broadcast %c4_i32 : i32 to vector<8x128xi32>
    %20 = arith.cmpi slt, %18, %19 : vector<8x128xi32>
    %cst_15 = arith.constant 0xFF800000 : f32
    %21 = vector.broadcast %cst_15 : f32 to vector<8x128xf32>
    %22 = arith.select %20, %17, %21 : vector<8x128xi1>, vector<8x128xf32>
    %cst_16 = arith.constant dense<0xFF800000> : vector<8xf32>
    %23 = vector.multi_reduction <maximumf>, %22, %cst_16 [1] : vector<8x128xf32> to vector<8xf32>
    %24 = vector.shape_cast %23 : vector<8xf32> to vector<8x1xf32>
    %25 = vector.broadcast %24 : vector<8x1xf32> to vector<8x128xf32>
    %26 = arith.subf %22, %25 : vector<8x128xf32>
    %27 = math.exp %26 : vector<8x128xf32>
    %cst_17 = arith.constant dense<0.000000e+00> : vector<8xf32>
    %28 = vector.multi_reduction <add>, %27, %cst_17 [1] : vector<8x128xf32> to vector<8xf32>
    %29 = vector.shape_cast %28 : vector<8xf32> to vector<8x1xf32>
    %30 = tpu.reciprocal %29 {approx = true} : vector<8x1xf32> -> vector<8x1xf32>
    %31 = arith.mulf %29, %30 : vector<8x1xf32>
    %cst_18 = arith.constant 2.000000e+00 : f32
    %32 = vector.broadcast %cst_18 : f32 to vector<8x1xf32>
    %33 = arith.subf %32, %31 : vector<8x1xf32>
    %34 = arith.mulf %30, %33 : vector<8x1xf32>
    %35 = vector.broadcast %34 : vector<8x1xf32> to vector<8x128xf32>
    %36 = arith.mulf %27, %35 : vector<8x128xf32>
    %37 = vector.broadcast %24 : vector<8x1xf32> to vector<8x128xf32>
    %38 = arith.subf %22, %37 : vector<8x128xf32>
    %39 = math.log %29 : vector<8x1xf32>
    %40 = vector.broadcast %39 : vector<8x1xf32> to vector<8x128xf32>
    %41 = arith.subf %38, %40 : vector<8x128xf32>
    %cst_19 = arith.constant 0.000000e+00 : f32
    %42 = vector.broadcast %cst_19 : f32 to vector<8x128xf32>
    %43 = arith.select %20, %41, %42 : vector<8x128xi1>, vector<8x128xf32>
    %44 = arith.mulf %36, %43 : vector<8x128xf32>
    %cst_20 = arith.constant dense<0.000000e+00> : vector<8xf32>
    %45 = vector.multi_reduction <add>, %44, %cst_20 [1] : vector<8x128xf32> to vector<8xf32>
    %46 = vector.shape_cast %45 : vector<8xf32> to vector<8x1xf32>
    %cst_21 = arith.constant 0.000000e+00 : f32
    %47 = vector.broadcast %cst_21 : f32 to vector<8x1xf32>
    %48 = arith.subf %47, %46 : vector<8x1xf32>
    %c0_22 = arith.constant 0 : index
    %c0_23 = arith.constant 0 : index
    %c0_24 = arith.constant 0 : index
    %49 = vector.load %arg8[%c0_22, %c0_23, %c0_24] : memref<3x8x128xf32, #tpu.memory_space<vmem>>, vector<1x8x128xf32>
    %50 = vector.shape_cast %49 : vector<1x8x128xf32> to vector<8x128xf32>
    %51 = vector.shape_cast %36 : vector<8x128xf32> to vector<1x8x128xf32>
    tpu.vector_store %arg8[%c0_22, %c0_23, %c0_24], %51 {strides = array<i32>} : memref<3x8x128xf32, #tpu.memory_space<vmem>>, vector<1x8x128xf32>,
    %c1 = arith.constant 1 : index
    %c0_25 = arith.constant 0 : index
    %c0_26 = arith.constant 0 : index
    %52 = vector.load %arg8[%c1, %c0_25, %c0_26] : memref<3x8x128xf32, #tpu.memory_space<vmem>>, vector<1x8x128xf32>
    %53 = vector.shape_cast %52 : vector<1x8x128xf32> to vector<8x128xf32>
    %54 = vector.shape_cast %43 : vector<8x128xf32> to vector<1x8x128xf32>
    tpu.vector_store %arg8[%c1, %c0_25, %c0_26], %54 {strides = array<i32>} : memref<3x8x128xf32, #tpu.memory_space<vmem>>, vector<1x8x128xf32>,
    %c4_i32_27 = arith.constant 4 : i32
    %55 = vector.broadcast %c4_i32_27 : i32 to vector<8x128xi32>
    %56 = arith.cmpi eq, %18, %55 : vector<8x128xi32>
    %c5_i32 = arith.constant 5 : i32
    %57 = vector.broadcast %c5_i32 : i32 to vector<8x128xi32>
    %58 = arith.cmpi eq, %18, %57 : vector<8x128xi32>
    %cst_28 = arith.constant 0.000000e+00 : f32
    %59 = vector.shape_cast %48 : vector<8x1xf32> to vector<8x1xf32>
    %60 = vector.broadcast %59 : vector<8x1xf32> to vector<8x128xf32>
    %61 = vector.broadcast %cst_28 : f32 to vector<8x128xf32>
    %62 = arith.select %58, %60, %61 : vector<8x128xi1>, vector<8x128xf32>
    %63 = arith.select %56, %17, %62 : vector<8x128xi1>, vector<8x128xf32>
    %c2 = arith.constant 2 : index
    %c0_29 = arith.constant 0 : index
    %c0_30 = arith.constant 0 : index
    %64 = vector.load %arg8[%c2, %c0_29, %c0_30] : memref<3x8x128xf32, #tpu.memory_space<vmem>>, vector<1x8x128xf32>
    %65 = vector.shape_cast %64 : vector<1x8x128xf32> to vector<8x128xf32>
    %66 = vector.shape_cast %63 : vector<8x128xf32> to vector<1x8x128xf32>
    tpu.vector_store %arg8[%c2, %c0_29, %c0_30], %66 {strides = array<i32>} : memref<3x8x128xf32, #tpu.memory_space<vmem>>, vector<1x8x128xf32>,
    return
  }
  func.func @transform_0(%arg0: i32) -> (i32, i32) {
    %c0_i32 = arith.constant 0 : i32
    %c0_i32_0 = arith.constant 0 : i32
    return %arg0, %c0_i32 : i32, i32
  }
  func.func @transform_1(%arg0: i32) -> (i32, i32) {
    %c0_i32 = arith.constant 0 : i32
    %c0_i32_0 = arith.constant 0 : i32
    %c0_i32_1 = arith.constant 0 : i32
    return %c0_i32, %c0_i32_0 : i32, i32
  }
  func.func @transform_2(%arg0: i32) -> (i32, i32) {
    %c0_i32 = arith.constant 0 : i32
    %c0_i32_0 = arith.constant 0 : i32
    %c0_i32_1 = arith.constant 0 : i32
    return %c0_i32, %c0_i32_0 : i32, i32
  }
  func.func @transform_3(%arg0: i32) -> (i32, i32) {
    %c0_i32 = arith.constant 0 : i32
    %c0_i32_0 = arith.constant 0 : i32
    %c0_i32_1 = arith.constant 0 : i32
    return %c0_i32, %c0_i32_0 : i32, i32
  }
  func.func @transform_4(%arg0: i32) -> (i32, i32) {
    %c0_i32 = arith.constant 0 : i32
    %c0_i32_0 = arith.constant 0 : i32
    %c0_i32_1 = arith.constant 0 : i32
    return %c0_i32, %c0_i32_0 : i32, i32
  }
  func.func @transform_5(%arg0: i32) -> (i32, i32) {
    %c0_i32 = arith.constant 0 : i32
    %c0_i32_0 = arith.constant 0 : i32
    %c0_i32_1 = arith.constant 0 : i32
    return %c0_i32, %c0_i32_0 : i32, i32
  }
  func.func @transform_6(%arg0: i32) -> (i32, i32) {
    %c0_i32 = arith.constant 0 : i32
    %c0_i32_0 = arith.constant 0 : i32
    %c0_i32_1 = arith.constant 0 : i32
    return %c0_i32, %c0_i32_0 : i32, i32
  }
  func.func @transform_7(%arg0: i32) -> (i32, i32, i32) {
    %c0_i32 = arith.constant 0 : i32
    %c0_i32_0 = arith.constant 0 : i32
    %c0_i32_1 = arith.constant 0 : i32
    return %c0_i32, %arg0, %c0_i32_0 : i32, i32, i32
  }
}

</mosaic_0001>

<bundles_post_ra>
// kernel: tpu_custom_call.1
= control target key start
LH: loop header
LB: loop body
LE: loop exit
PB: predicated region body
PF: predicated region fallthrough
CT: control target
= control target key end

     0   :  { %12 = vsyncpa [#allocation3], 0  ;;  %s864_s0 = inlined_call_operand.hbm [shape: f32[8,16], index: 0, kind: input, shape index: {}]   ;;  %s865_s1 = inlined_call_operand.hbm [shape: f32[16,128], index: 1, kind: input, shape index: {}]   ;;  %s866_s2 = inlined_call_operand.vmem [shape: f32[1,128], index: 2, kind: input, shape index: {}]   ;;  %s867_s3 = inlined_call_operand.hbm [shape: f32[128,128], index: 3, kind: input, shape index: {}]   ;;  %s868_s4 = inlined_call_operand.vmem [shape: f32[1,128], index: 4, kind: input, shape index: {}]   ;;  %s869_s5 = inlined_call_operand.hbm [shape: f32[128,128], index: 5, kind: input, shape index: {}]   ;;  %s870_s6 = inlined_call_operand.vmem [shape: f32[1,128], index: 6, kind: input, shape index: {}]   ;;  %s871_s7 = inlined_call_operand.hbm [shape: f32[3,8,128], index: 7, kind: output, shape index: {}]  }
   0x1   :  { %13 = vsyncpa [#allocation6], 0 }
   0x2   :  { %14 = vsyncpa [#allocation9], 0 }
   0x3   :  { %15 = vsyncpa [#allocation4], 0  ;;  %s711_s24 = smov [#allocation5]   ;;  %s593_s28 = scalar_lea.hbm %s865_s1, 256 }
   0x4   :  { %s31_s25 = sshll.u32 %s711_s24, 4  ;;  %p594_p0 = scmp.ne.s32.totalorder %s865_s1, %s593_s28  ;;  %s32_s25 = int_to_ptr.vmem [resolvable:$true] %s31_s25 }
   0x5   :  { %p597_p1 = scmp.lt.u32.totalorder %s593_s28, %s865_s1 }
   0x7   :  { %p599_p2 = pnand %p597_p1, %p594_p0 }
   0x9   :  { %602 = shalt.err (!%p599_p2)
}
   0xa   :  { %s603_s10 = scalar_lea.vmem %s32_s25, 256  ;;  %p608_p4 = scmp.lt.s32.totalorder %s32_s25, %s32_s25 }
   0xb   :  { %p604_p3 = scmp.ne.s32.totalorder %s32_s25, %s603_s10  ;;  %p609_p5 = scmp.lt.s32.totalorder %s603_s10, %s603_s10 }
   0xd   :  { %p610_p6 = por %p609_p5, %p608_p4 }
   0xf   :  { %p611_p7 = pnand %p610_p6, %p604_p3 }
  0x11   :  { %614 = shalt.err (!%p611_p7)
}
  0x12   :  { %s712_s11 = smov 128   ;;  %s713_s12 = smov 8  }
  0x13   :  { %37 = dma.hbm_to_vmem [thread:$0]  %s865_s1, 256, %s32_s25, [#allocation6], %s712_s11, %s712_s11, %s713_s12  }
  0x14   :  { %s714_s15 = smov [#allocation2]   ;;  %s715_s17 = smov [#allocation7]  }
  0x15   :  { %s22_s16 = sshll.u32 %s714_s15, 4  ;;  %s45_s18 = sshll.u32 %s715_s17, 4  ;;  %s23_s16 = int_to_ptr.vmem [resolvable:$true] %s22_s16  ;;  %s46_s18 = int_to_ptr.vmem [resolvable:$true] %s45_s18 }
  0x16   :  { %s615_s21 = scalar_lea.hbm %s864_s0, 128 }
  0x17   :  { %p616_p8 = scmp.ne.s32.totalorder %s864_s0, %s615_s21  ;;  %p619_p9 = scmp.lt.u32.totalorder %s615_s21, %s864_s0 }
  0x19   :  { %p621_p10 = pnand %p619_p9, %p616_p8 }
  0x1b   :  { %624 = shalt.err (!%p621_p10)
}
  0x1c   :  { %s625_s1 = scalar_lea.vmem %s23_s16, 128  ;;  %p630_p12 = scmp.lt.s32.totalorder %s23_s16, %s23_s16 }
  0x1d   :  { %p626_p11 = scmp.ne.s32.totalorder %s23_s16, %s625_s1  ;;  %p631_p13 = scmp.lt.s32.totalorder %s625_s1, %s625_s1 }
  0x1f   :  { %p632_p0 = por %p631_p13, %p630_p12 }
  0x21   :  { %p633_p1 = pnand %p632_p0, %p626_p11 }
  0x23   :  { %636 = shalt.err (!%p633_p1)
}
  0x24   :  { %25 = dma.hbm_to_vmem [thread:$0]  %s864_s0, 128, %s23_s16, [#allocation3]  }
  0x25   :  { %s637_s30 = scalar_lea.hbm %s867_s3, 2048 }
  0x26   :  { %p638_p2 = scmp.ne.s32.totalorder %s867_s3, %s637_s30  ;;  %p641_p3 = scmp.lt.u32.totalorder %s637_s30, %s867_s3 }
  0x28   :  { %p643_p4 = pnand %p641_p3, %p638_p2 }
  0x2a   :  { %646 = shalt.err (!%p643_p4)
}
  0x2b   :  { %s647_s14 = scalar_lea.vmem %s46_s18, 2048  ;;  %p652_p6 = scmp.lt.s32.totalorder %s46_s18, %s46_s18 }
  0x2c   :  { %p648_p5 = scmp.ne.s32.totalorder %s46_s18, %s647_s14  ;;  %p653_p7 = scmp.lt.s32.totalorder %s647_s14, %s647_s14 }
  0x2e   :  { %p654_p8 = por %p653_p7, %p652_p6 }
  0x30   :  { %p655_p9 = pnand %p654_p8, %p648_p5 }
  0x32   :  { %658 = shalt.err (!%p655_p9)
}
  0x33   :  { %51 = dma.hbm_to_vmem [thread:$0]  %s867_s3, 2048, %s46_s18, [#allocation6], %s712_s11, %s712_s11, %s713_s12  }
  0x34   :  { %s716_s16 = smov [#allocation8]   ;;  %s659_s21 = scalar_lea.hbm %s869_s5, 2048 }
  0x35   :  { %s59_s17 = sshll.u32 %s716_s16, 4  ;;  %p660_p10 = scmp.ne.s32.totalorder %s869_s5, %s659_s21  ;;  %s60_s17 = int_to_ptr.vmem [resolvable:$true] %s59_s17 }
  0x36   :  { %p663_p11 = scmp.lt.u32.totalorder %s659_s21, %s869_s5 }
  0x38   :  { %p665_p12 = pnand %p663_p11, %p660_p10 }
  0x3a   :  { %668 = shalt.err (!%p665_p12)
}
  0x3b   :  { %s669_s1 = scalar_lea.vmem %s60_s17, 2048  ;;  %p674_p0 = scmp.lt.s32.totalorder %s60_s17, %s60_s17 }
  0x3c   :  { %p670_p13 = scmp.ne.s32.totalorder %s60_s17, %s669_s1  ;;  %p675_p1 = scmp.lt.s32.totalorder %s669_s1, %s669_s1 }
  0x3e   :  { %p676_p2 = por %p675_p1, %p674_p0 }
  0x40   :  { %p677_p3 = pnand %p676_p2, %p670_p13 }
  0x42   :  { %680 = shalt.err (!%p677_p3)
}
  0x43   :  { %65 = dma.hbm_to_vmem [thread:$0]  %s869_s5, 2048, %s60_s17, [#allocation9], %s712_s11, %s712_s11, %s713_s12  }
  0x44   :  { %703 = dma.done.wait [#allocation3], 128  }
  0x45   :  { %704 = vsyncadd [#allocation3], 4294967168 }
  0x46   :  { %705 = dma.done.wait [#allocation6], 2304  }
  0x47   :  { %706 = vsyncadd [#allocation6], 4294964992 }
  0x48   :  { %707 = dma.done.wait [#allocation9], 2048  }
  0x49   :  { %708 = vsyncadd [#allocation9], 4294965248  ;;  %v717_v0 = vmov 0.0|0.0   ;;  %vm718_vm0 = vmmov 0   ;;  %v719_v1 = vmov 0.0   ;;  %v81_v2 = vld [vmem:[#allocation5] sm:$0xff] }
  0x4a   :  { %522 = vmatprep.subr.bf16.mxu0 %v717_v0  ;;  %449 = vmatprep.mubr.msk.f32.mxu0 %vm718_vm0, %v719_v1  ;;  %v82_v3 = vld [vmem:[#allocation5 + $0x8] sm:$0xff]  ;;  %v165_v5 = vld [vmem:[#allocation7] sm:$0xff]  ;;  %v166_v6 = vld [vmem:[#allocation7 + $0x8] sm:$0xff]  ;;  %vm90_vm1 = vcmask 130048  }
  0x4b   :  { %525 = vmatprep.subr.bf16.mxu1 %v717_v0  ;;  %484 = vmatprep.mubr.msk.f32.mxu1 %vm718_vm0, %v719_v1  ;;  %v523_v4 = vpack.c.bf16 %v82_v3, %v81_v2  ;;  %v167_v7 = vld [vmem:[#allocation7 + $0x10] sm:$0xff]  ;;  %v526_v8 = vpack.c.bf16 %v166_v6, %v165_v5  ;;  %v168_v9 = vld [vmem:[#allocation7 + $0x18] sm:$0xff]  ;;  %v80_v10 = vld [vmem:[#allocation2] sm:$0xff] }
  0x4c   :  { %v529_v11 = vpack.c.bf16 %v168_v9, %v167_v7  ;;  %v169_v12 = vld [vmem:[#allocation7 + $0x20] sm:$0xff]  ;;  %v170_v13 = vld [vmem:[#allocation7 + $0x28] sm:$0xff]  ;;  %v171_v15 = vld [vmem:[#allocation7 + $0x30] sm:$0xff] }
  0x4d   :  { %524 = vmatpush3.bf16.msra.mxu0 %v523_v4  ;;  %527 = vmatpush3.bf16.msra.mxu1 %v526_v8  ;;  %v532_v14 = vpack.c.bf16 %v170_v13, %v169_v12  ;;  %v172_v16 = vld [vmem:[#allocation7 + $0x38] sm:$0xff]  ;;  %v173_v18 = vld [vmem:[#allocation7 + $0x40] sm:$0xff]  ;;  %v174_v19 = vld [vmem:[#allocation7 + $0x48] sm:$0xff] }
  0x4e   :  { %549 = vmatprep.subr.bf16.mxu0 %v717_v0  ;;  %528 = vmatprep.subr.bf16.mxu1 %v717_v0  ;;  %v535_v17 = vpack.c.bf16 %v172_v16, %v171_v15  ;;  %v538_v20 = vpack.c.bf16 %v174_v19, %v173_v18  ;;  %v175_v21 = vld [vmem:[#allocation7 + $0x50] sm:$0xff]  ;;  %v176_v22 = vld [vmem:[#allocation7 + $0x58] sm:$0xff]  ;;  %v177_v24 = vld [vmem:[#allocation7 + $0x60] sm:$0xff] }
  0x4f   :  { %v541_v23 = vpack.c.bf16 %v176_v22, %v175_v21  ;;  %v178_v25 = vld [vmem:[#allocation7 + $0x68] sm:$0xff]  ;;  %v179_v27 = vld [vmem:[#allocation7 + $0x70] sm:$0xff]  ;;  %v180_v28 = vld [vmem:[#allocation7 + $0x78] sm:$0xff] }
  0x50   :  { %450 = vmatmul.mubr.msk.f32.vlgmr.msra.gmra.mrb[0].mxu0 %vm90_vm1, %v80_v10  ;;  %v544_v26 = vpack.c.bf16 %v178_v25, %v177_v24  ;;  %v547_v29 = vpack.c.bf16 %v180_v28, %v179_v27  ;;  %v259_v30 = vld [vmem:[#allocation8] sm:$0xff]  ;;  %v260_v31 = vld [vmem:[#allocation8 + $0x8] sm:$0xff]  ;;  %v261_v32 = vld [vmem:[#allocation8 + $0x10] sm:$0xff] }
  0x51   :  { %519 = vmatprep.mubr.msk.f32.mxu0 %vm718_vm0, %v719_v1  ;;  %530 = vmatpush3.bf16.msra.mxu1 %v529_v11  ;;  %v550_v33 = vpack.c.bf16 %v260_v31, %v259_v30  ;;  %v262_v34 = vld [vmem:[#allocation8 + $0x18] sm:$0xff]  ;;  %v263_v36 = vld [vmem:[#allocation8 + $0x20] sm:$0xff]  ;;  %v264_v37 = vld [vmem:[#allocation8 + $0x28] sm:$0xff]  ;;  %v352_v1 = vlaneseq }
  0x52   :  { %531 = vmatprep.subr.bf16.mxu1 %v717_v0  ;;  %v553_v35 = vpack.c.bf16 %v262_v34, %v261_v32  ;;  %v556_v38 = vpack.c.bf16 %v264_v37, %v263_v36  ;;  %v265_v39 = vld [vmem:[#allocation8 + $0x30] sm:$0xff]  ;;  %v266_v40 = vld [vmem:[#allocation8 + $0x38] sm:$0xff]  ;;  %v267_v42 = vld [vmem:[#allocation8 + $0x40] sm:$0xff] }
  0x53   :  { %551 = vmatpush3.bf16.msra.mxu0 %v550_v33  ;;  %v559_v41 = vpack.c.bf16 %v266_v40, %v265_v39  ;;  %v268_v43 = vld [vmem:[#allocation8 + $0x48] sm:$0xff]  ;;  %v269_v50 = vld [vmem:[#allocation8 + $0x50] sm:$0xff]  ;;  %v270_v51 = vld [vmem:[#allocation8 + $0x58] sm:$0xff]  ;;  %v353_v2 = vand.u32 127, %v352_v1 }
  0x54   :  { %552 = vmatprep.subr.bf16.mxu0 %v717_v0  ;;  %v562_v44 = vpack.c.bf16 %v268_v43, %v267_v42  ;;  %v404_v45 = vld [vmem:[%s866_s2] ss:$0 sm:$0xff]  ;;  %v565_v52 = vpack.c.bf16 %v270_v51, %v269_v50  ;;  %v271_v53 = vld [vmem:[#allocation8 + $0x60] sm:$0xff]  ;;  %v273_v56 = vld [vmem:[#allocation8 + $0x70] sm:$0xff] }
  0x55   :  { %533 = vmatpush3.bf16.msra.mxu1 %v532_v14  ;;  %v272_v54 = vld [vmem:[#allocation8 + $0x68] sm:$0xff]  ;;  %v274_v57 = vld [vmem:[#allocation8 + $0x78] sm:$0xff]  ;;  %vm354_vm2 = vcmp.lt.s32.totalorder %v353_v2, 4  ;;  %vm380_vm3 = vcmp.eq.s32.totalorder %v353_v2, 5  ;;  %vm379_vm4 = vcmp.eq.s32.totalorder %v353_v2, 4 }
  0x56   :  { %534 = vmatprep.subr.bf16.mxu1 %v717_v0  ;;  %v568_v55 = vpack.c.bf16 %v272_v54, %v271_v53  ;;  %v571_v58 = vpack.c.bf16 %v274_v57, %v273_v56  ;;  %v406_v59 = vld [vmem:[%s868_s4] ss:$0 sm:$0xff]  ;;  %s720_s4 = smov [#allocation10]  }
  0x57   :  { %554 = vmatpush3.bf16.msra.mxu0 %v553_v35  ;;  %v407_v3 = vld [vmem:[%s870_s6] ss:$0 sm:$0xff]  ;;  %s390_s6 = sshll.u32 %s720_s4, 4  ;;  %s391_s6 = int_to_ptr.vmem [resolvable:$true] %s390_s6 }
  0x58   :  { %555 = vmatprep.subr.bf16.mxu0 %v717_v0  ;;  %s681_s30 = scalar_lea.vmem %s391_s6, 384  ;;  %p686_p5 = scmp.lt.s32.totalorder %s391_s6, %s391_s6 }
  0x59   :  { %536 = vmatpush3.bf16.msra.mxu1 %v535_v17  ;;  %p682_p4 = scmp.ne.s32.totalorder %s391_s6, %s681_s30  ;;  %p687_p6 = scmp.lt.s32.totalorder %s681_s30, %s681_s30 }
  0x5a   :  { %537 = vmatprep.subr.bf16.mxu1 %v717_v0 }
  0x5b   :  { %557 = vmatpush3.bf16.msra.mxu0 %v556_v38  ;;  %p688_p7 = por %p687_p6, %p686_p5 }
  0x5c   :  { %558 = vmatprep.subr.bf16.mxu0 %v717_v0 }
  0x5d   :  { %539 = vmatpush3.bf16.msra.mxu1 %v538_v20  ;;  %p689_p8 = pnand %p688_p7, %p682_p4 }
  0x5e   :  { %540 = vmatprep.subr.bf16.mxu1 %v717_v0 }
  0x5f   :  { %560 = vmatpush3.bf16.msra.mxu0 %v559_v41 }
  0x60   :  { %561 = vmatprep.subr.bf16.mxu0 %v717_v0 }
  0x61   :  { %542 = vmatpush3.bf16.msra.mxu1 %v541_v23 }
  0x62   :  { %543 = vmatprep.subr.bf16.mxu1 %v717_v0 }
  0x63   :  { %563 = vmatpush3.bf16.msra.mxu0 %v562_v44 }
  0x64   :  { %564 = vmatprep.subr.bf16.mxu0 %v717_v0 }
  0x65   :  { %545 = vmatpush3.bf16.msra.mxu1 %v544_v26 }
  0x66   :  { %546 = vmatprep.subr.bf16.mxu1 %v717_v0 }
  0x67   :  { %566 = vmatpush3.bf16.msra.mxu0 %v565_v52 }
  0x68   :  { %567 = vmatprep.subr.bf16.mxu0 %v717_v0 }
  0x69   :  { %548 = vmatpush3.bf16.msra.mxu1 %v547_v29 }
  0x6b   :  { %569 = vmatpush3.bf16.msra.mxu0 %v568_v55 }
  0x6c   :  { %570 = vmatprep.subr.bf16.mxu0 %v717_v0 }
  0x6f   :  { %572 = vmatpush3.bf16.msra.mxu0 %v571_v58 }
 0x123   :  { %v160_v46 = vpop.f32.mrb[0].mxu0 }
 0x124   :  { %v161_v47 = vadd.f32 %v404_v45, %v160_v46  ;;  %v451_v48 = vpop.f32.mrb[1].mxu0 }
 0x126   :  { %583 = vtanh.f32 %v161_v47 }
 0x130   :  { %v584_v49 = vpop.eup %583 }
 0x131   :  { %485 = vmatmul.mubr.f32.vlgmr.msra.gmra.mrb[0].mxu1 %v584_v49 }
 0x204   :  { %v254_v60 = vpop.f32.mrb[0].mxu1 }
 0x205   :  { %v255_v61 = vadd.f32 %v406_v59, %v254_v60  ;;  %v486_v62 = vpop.f32.mrb[1].mxu1 }
 0x207   :  { %585 = vtanh.f32 %v255_v61 }
 0x211   :  { %v586_v63 = vpop.eup %585 }
 0x212   :  { %520 = vmatmul.mubr.f32.vlgmr.msra.gmra.mrb[2].mxu0 %v586_v63 }
 0x2e5   :  { %v348_v4 = vpop.f32.mrb[2].mxu0 }
 0x2e6   :  { %v349_v0 = vadd.f32 %v407_v3, %v348_v4  ;;  %v521_v5 = vpop.f32.mrb[3].mxu0 }
 0x2e8   :  { %v355_v6 = vsel %vm354_vm2, %v349_v0, -inf }
 0x2e9   :  { %356 = vmax.xlane.f32.xlu0 %v355_v6 }
 0x376   :  { %v357_v7 = vpop.xlane.xlu0 %356 }
 0x377   :  { %v358_v8 = vsub.f32 %v355_v6, %v357_v7 }
 0x379   :  { %v359_v9 = vmul.f32 1.442695, %v358_v8 }
 0x37b   :  { %587 = vpow2.f32 %v359_v9 }
 0x385   :  { %v588_v10 = vpop.eup %587 }
 0x386   :  { %361 = vadd.xlane.f32.xlu0 %v588_v10 }
 0x413   :  { %v362_v11 = vpop.xlane.xlu0 %361 }
 0x414   :  { %589 = vrcp.f32 %v362_v11 }
 0x415   :  { %591 = vlog2.f32 %v362_v11 }
 0x41e   :  { %v590_v12 = vpop.eup %589 }
 0x41f   :  { %v592_v13 = vpop.eup %591  ;;  %v364_v14 = vmul.f32 %v590_v12, %v362_v11 }
 0x420   :  { %v369_v15 = vmul.f32 0.6931472, %v592_v13 }
 0x421   :  { %v365_v16 = vsub.f32 2.0, %v364_v14 }
 0x422   :  { %v370_v17 = vsub.f32 %v358_v8, %v369_v15 }
 0x423   :  { %v366_v18 = vmul.f32 %v590_v12, %v365_v16 }
 0x424   :  { %v371_v19 = vsel %vm354_vm2, %v370_v17, 0.0 }
 0x425   :  { %v367_v20 = vmul.f32 %v588_v10, %v366_v18  ;;  %378 = vst [vmem:[#allocation10 + $0x8] sm:$0xff] %v371_v19 }
 0x427   :  { %v372_v21 = vmul.f32 %v371_v19, %v367_v20  ;;  %376 = vst [vmem:[#allocation10] sm:$0xff] %v367_v20 }
 0x429   :  { %373 = vadd.xlane.f32.xlu1 %v372_v21 }
 0x4b6   :  { %v374_v22 = vpop.xlane.xlu1 %373 }
 0x4b7   :  { %v375_v23 = vsub.f32 0.0, %v374_v22 }
 0x4b9   :  { %v381_v24 = vsel %vm380_vm3, %v375_v23, 0.0 }
 0x4ba   :  { %v382_v25 = vsel %vm379_vm4, %v349_v0, %v381_v24 }
 0x4bb   :  { %384 = vst [vmem:[#allocation10 + $0x10] sm:$0xff] %v382_v25 }
 0x4bc   :  { %692 = shalt.err (!%p689_p8)
}
 0x4bd   :  { %s693_s10 = scalar_lea.hbm %s871_s7, 384 }
 0x4be   :  { %p694_p9 = scmp.ne.s32.totalorder %s871_s7, %s693_s10  ;;  %p697_p10 = scmp.lt.u32.totalorder %s693_s10, %s871_s7 }
 0x4c0   :  { %p699_p11 = pnand %p697_p10, %p694_p9 }
 0x4c2   :  { %702 = shalt.err (!%p699_p11)
}
 0x4c3   :  { %396 = dma.vmem_to_hbm [thread:$0]  %s391_s6, 384, %s871_s7, [#allocation4], %s712_s11, %s712_s11, %s713_s12  }
 0x4c4   :  { %709 = dma.done.wait [#allocation4], 384  }
 0x4c5   :  { %710 = vsyncadd [#allocation4], 4294966912 }
 0x4c6   :  { %400 = vsyncpa [#allocation3], 1 }
 0x4c7   :  { %401 = vsyncpa [#allocation6], 1 }
 0x4c8   :  { %402 = vsyncpa [#allocation9], 1 }
 0x4c9   :  { %403 = vsyncpa [#allocation4], 1 }

</bundles_post_ra>
